<compile_context>
chip_gen: v6e
topology: v6e:2x2x1
jax: 0.10.0
libtpu: 0.0.40
codegen_flags: <defaults>
</compile_context>

<pallas_src>
import functools
import math

import jax
import jax.numpy as jnp
from jax.experimental import pallas as pl
from jax.experimental.pallas import tpu as pltpu


# ----------------------------------------------------------------------------
# helpers
# ----------------------------------------------------------------------------
def _round_up(x, m):
    return (x + m - 1) // m * m


def _pad_to(x, target_shape):
    pads = [(0, t - s) for s, t in zip(x.shape, target_shape)]
    if any(p[1] for p in pads):
        x = jnp.pad(x, pads)
    return x


def _tile_config():
    """Generation-aware tile caps & VMEM limit (v7x has half the VMEM)."""
    try:
        vmem = pltpu.get_tpu_info().vmem_capacity_bytes
    except Exception:
        vmem = 64 * 1024 * 1024  # conservative default (v7x-sized)
    if vmem >= 100 * 1024 * 1024:  # v5e / v6e: 128 MiB VMEM
        return dict(tq=1024, tkv=512, vmem_limit=96 * 1024 * 1024)
    # v7x: 64 MiB VMEM per TensorCore.
    return dict(tq=256, tkv=512, vmem_limit=48 * 1024 * 1024)


def _pick_seq_tile(s, cap):
    """Seq tile (multiple of 8, <= cap) minimizing padded length; prefer larger."""
    s8 = _round_up(s, 8)
    if s8 <= min(cap, 128):
        return s8
    best_pad, best_t = None, 128
    t = 128
    while t <= cap:
        pad = _round_up(s, t)
        if best_pad is None or pad <= best_pad:
            best_pad, best_t = pad, t
        t *= 2
    return best_t


# ----------------------------------------------------------------------------
# kernel 1: fused K & V projections, weights fully resident, no reduction axis
#   k[b,s,:] = x2[b,s,:] @ Wk + bk ;  v[b,s,:] = x3[b,s,:] @ Wv + bv
# ----------------------------------------------------------------------------
def _kv_proj_kernel(x2_ref, x3_ref, wk_ref, wv_ref, bk_ref, bv_ref, k_ref, v_ref):
    k_ref[...] = (jnp.dot(x2_ref[...], wk_ref[...],
                          preferred_element_type=jnp.float32)
                  + bk_ref[...]).astype(k_ref.dtype)
    v_ref[...] = (jnp.dot(x3_ref[...], wv_ref[...],
                          preferred_element_type=jnp.float32)
                  + bv_ref[...]).astype(v_ref.dtype)


def kv_projection(x2, x3, wk_t, wv_t, bk, bv, *, ts, vmem_limit, out_dtype):
    """x2, x3: (B, Skvp, Dp) bf16; wk_t/wv_t: (Dp, Dp) bf16; bk/bv: (1, Dp) f32."""
    B, Sp, Dp = x2.shape
    grid = (B, Sp // ts)
    return pl.pallas_call(
        _kv_proj_kernel,
        out_shape=(jax.ShapeDtypeStruct((B, Sp, Dp), out_dtype),
                   jax.ShapeDtypeStruct((B, Sp, Dp), out_dtype)),
        grid_spec=pltpu.PrefetchScalarGridSpec(
            num_scalar_prefetch=0,
            grid=grid,
            in_specs=[
                pl.BlockSpec((None, ts, Dp), lambda b, i: (b, i, 0)),
                pl.BlockSpec((None, ts, Dp), lambda b, i: (b, i, 0)),
                # Constant index maps -> weights/biases DMA'd once, stay resident.
                pl.BlockSpec((Dp, Dp), lambda b, i: (0, 0)),
                pl.BlockSpec((Dp, Dp), lambda b, i: (0, 0)),
                pl.BlockSpec((1, Dp), lambda b, i: (0, 0)),
                pl.BlockSpec((1, Dp), lambda b, i: (0, 0)),
            ],
            out_specs=[
                pl.BlockSpec((None, ts, Dp), lambda b, i: (b, i, 0)),
                pl.BlockSpec((None, ts, Dp), lambda b, i: (b, i, 0)),
            ],
        ),
        compiler_params=pltpu.CompilerParams(
            dimension_semantics=("parallel", "parallel"),
            vmem_limit_bytes=vmem_limit,
        ),
    )(x2, x3, wk_t, wv_t, bk, bv)


# ----------------------------------------------------------------------------
# kernel 2: flash attention with the Q projection fused into the kv==0 prologue
# ----------------------------------------------------------------------------
def _flash_kernel(x1_ref, wq_ref, bq_ref, k_ref, v_ref, o_ref,
                  q_sc, m_sc, l_sc, acc_sc, *, kv_valid, block_kv, mask_last):
    kv = pl.program_id(2)
    last = pl.num_programs(2) - 1

    @pl.when(kv == 0)
    def _():
        # Fused Q projection; 1/sqrt(D) already folded into wq/bq on the host.
        # wq/bq are VMEM-resident (constant index_map): Q never touches HBM.
        q = jnp.dot(x1_ref[...], wq_ref[...], preferred_element_type=jnp.float32)
        q_sc[...] = (q + bq_ref[...]).astype(q_sc.dtype)
        m_sc[...] = jnp.full_like(m_sc, -jnp.inf)
        l_sc[...] = jnp.zeros_like(l_sc)
        acc_sc[...] = jnp.zeros_like(acc_sc)

    # scores (tq, tkv), f32 accumulation on the MXU
    s = jax.lax.dot_general(q_sc[...], k_ref[...], (((1,), (1,)), ((), ())),
                            preferred_element_type=jnp.float32)

    def update(scores):
        m_prev = m_sc[...]                                      # (tq,128) replicated
        m_next = jnp.maximum(m_prev, jnp.max(scores, axis=-1, keepdims=True))
        alpha = jnp.exp(m_prev - m_next)                        # (tq,128)
        p = jnp.exp(scores - m_next[:, 0:1])                    # (tq,tkv)
        l_sc[...] = alpha * l_sc[...] + jnp.sum(p, axis=-1, keepdims=True)
        acc_sc[...] = alpha[:, 0:1] * acc_sc[...] + jnp.dot(
            p.astype(v_ref.dtype), v_ref[...], preferred_element_type=jnp.float32)
        m_sc[...] = m_next

    if mask_last:  # static: only emitted when kv padding exists; mask last tile only
        @pl.when(kv == last)
        def _():
            col = kv * block_kv + jax.lax.broadcasted_iota(jnp.int32, s.shape, 1)
            update(jnp.where(col < kv_valid, s, -1e30))

        @pl.when(kv != last)
        def _():
            update(s)
    else:
        update(s)

    @pl.when(kv == last)
    def _():
        inv_l = pl.reciprocal(l_sc[...], approx=True)           # EUP slot, ~free
        o_ref[...] = (acc_sc[...] * inv_l[:, 0:1]).astype(o_ref.dtype)


def flash_attention_fused_q(x1, wq_t, bq, k, v, *, kv_len, tq, tkv,
                            vmem_limit, mxu_dtype, out_dtype):
    """x1: (B, Sqp, Dp) bf16; wq_t: (Dp, Dp) bf16 (scale folded); bq: (1, Dp) f32;
    k, v: (B, Skvp, Dp) bf16."""
    B, Sqp, Dp = x1.shape
    _, Skvp, _ = k.shape
    grid = (B, Sqp // tq, Skvp // tkv)
    mask_last = (Skvp != kv_len)
    kern = functools.partial(_flash_kernel, kv_valid=kv_len, block_kv=tkv,
                             mask_last=mask_last)
    return pl.pallas_call(
        kern,
        out_shape=jax.ShapeDtypeStruct((B, Sqp, Dp), out_dtype),
        grid_spec=pltpu.PrefetchScalarGridSpec(
            num_scalar_prefetch=0,
            grid=grid,
            in_specs=[
                pl.BlockSpec((None, tq, Dp), lambda b, qi, ki: (b, qi, 0)),
                pl.BlockSpec((Dp, Dp), lambda b, qi, ki: (0, 0)),   # resident wq
                pl.BlockSpec((1, Dp), lambda b, qi, ki: (0, 0)),    # resident bq
                pl.BlockSpec((None, tkv, Dp), lambda b, qi, ki: (b, ki, 0)),
                pl.BlockSpec((None, tkv, Dp), lambda b, qi, ki: (b, ki, 0)),
            ],
            out_specs=pl.BlockSpec((None, tq, Dp), lambda b, qi, ki: (b, qi, 0)),
            scratch_shapes=[
                pltpu.VMEM((tq, Dp), mxu_dtype),       # fused-Q tile
                pltpu.VMEM((tq, 128), jnp.float32),    # running max (lane-replicated)
                pltpu.VMEM((tq, 128), jnp.float32),    # running denom
                pltpu.VMEM((tq, Dp), jnp.float32),     # output accumulator
            ],
        ),
        compiler_params=pltpu.CompilerParams(
            dimension_semantics=("parallel", "parallel", "arbitrary"),
            vmem_limit_bytes=vmem_limit,
        ),
    )(x1, wq_t, bq, k, v)


# ----------------------------------------------------------------------------
# full forward pass (matches torch Attention.forward)
# ----------------------------------------------------------------------------
def attention_forward(params, x1, x2, x3, *, tiles=None, mxu_dtype=jnp.bfloat16):
    B, Sq, D = x1.shape
    Bk, Skv, Dk = x2.shape
    assert Dk == D and x3.shape == x2.shape and Bk == B

    cfg = tiles or _tile_config()
    vmem_limit = cfg["vmem_limit"]

    Dp = _round_up(D, 128)                 # lane-dense feature dim
    tq = _pick_seq_tile(Sq, cfg["tq"])     # picked to minimize padding waste
    tkv = _pick_seq_tile(Skv, cfg["tkv"])
    Sqp = _round_up(Sq, tq)
    Skvp = _round_up(Skv, tkv)
    # Invariant for padded-key masking: the last kv tile always has >= 1 valid key.
    assert Skvp - tkv < Skv

    scale = 1.0 / math.sqrt(D)             # torch: scores / input_dim ** 0.5

    x1p = _pad_to(x1, (B, Sqp, Dp)).astype(mxu_dtype)
    x2p = _pad_to(x2, (B, Skvp, Dp)).astype(mxu_dtype)
    x3p = _pad_to(x3, (B, Skvp, Dp)).astype(mxu_dtype)

    def prep(wname, bname, s=1.0):
        w_t = _pad_to(jnp.transpose(params[wname]) * s, (Dp, Dp)).astype(mxu_dtype)
        b = _pad_to((params[bname] * s).reshape(1, D).astype(jnp.float32), (1, Dp))
        return w_t, b

    wq_t, bq = prep("wq", "bq", scale)     # fold 1/sqrt(D) into the Q projection
    wk_t, bk = prep("wk", "bk")
    wv_t, bv = prep("wv", "bv")

    # One fused call for K & V projections (weights resident, no reduction axis).
    k, v = kv_projection(x2p, x3p, wk_t, wv_t, bk, bv,
                         ts=tkv, vmem_limit=vmem_limit, out_dtype=mxu_dtype)

    # Flash attention with the Q projection fused into its prologue.
    out = flash_attention_fused_q(x1p, wq_t, bq, k, v, kv_len=Skv,
                                  tq=tq, tkv=tkv, vmem_limit=vmem_limit,
                                  mxu_dtype=mxu_dtype, out_dtype=x1.dtype)
    return out[:, :Sq, :D]


def attention_reference(params, x1, x2, x3):
    d = x1.shape[-1]
    q = x1 @ params["wq"].T + params["bq"]
    k = x2 @ params["wk"].T + params["bk"]
    v = x3 @ params["wv"].T + params["bv"]
    s = jnp.einsum("bqd,bkd->bqk", q, k) / math.sqrt(d)
    a = jax.nn.softmax(s, axis=-1)
    return jnp.einsum("bqk,bkd->bqd", a, v)


def init_attention_params(key, d):
    ks = jax.random.split(key, 6)

    def w(kk):
        return jax.random.normal(kk, (d, d), jnp.float32) / math.sqrt(d)

    def b(kk):
        return 0.1 * jax.random.normal(kk, (d,), jnp.float32)

    return {"wq": w(ks[0]), "bq": b(ks[1]),
            "wk": w(ks[2]), "bk": b(ks[3]),
            "wv": w(ks[4]), "bv": b(ks[5])}


# ----------------------------------------------------------------------------
if __name__ == "__main__":
    key = jax.random.PRNGKey(0)
    kp, k1, k2, k3 = jax.random.split(key, 4)

    B, Sq, Skv, D = 2, 8, 8, 32
    params = init_attention_params(kp, D)
    x1 = jax.random.normal(k1, (B, Sq, D), jnp.float32)
    x2 = jax.random.normal(k2, (B, Skv, D), jnp.float32)
    x3 = jax.random.normal(k3, (B, Skv, D), jnp.float32)

    cfg = _tile_config()  # resolve generation-specific tiles once, outside jit
    fwd = jax.jit(functools.partial(attention_forward, tiles=cfg))
    out = jax.block_until_ready(fwd(params, x1, x2, x3))

    assert out.shape == (B, Sq, D), out.shape
    assert bool(jnp.all(jnp.isfinite(out)))

    # Pure-JAX reference check (bf16 MXU operands, f32 accumulation -> loose tol).
    ref = attention_reference(params, x1, x2, x3)
    max_err = float(jnp.max(jnp.abs(out - ref)))
    assert max_err < 1e-1, f"max abs err vs reference: {max_err}"

    print("KERNEL_OK")
</pallas_src>

<mosaic_0001>
module attributes {stable_mosaic.version = 11 : i64} {
  func.func @_kv_proj_kernel(%arg0: i32, %arg1: i32, %arg2: memref<1x8x128xbf16, #tpu.memory_space<vmem>>, %arg3: memref<1x8x128xbf16, #tpu.memory_space<vmem>>, %arg4: memref<128x128xbf16, #tpu.memory_space<vmem>>, %arg5: memref<128x128xbf16, #tpu.memory_space<vmem>>, %arg6: memref<1x128xf32, #tpu.memory_space<vmem>>, %arg7: memref<1x128xf32, #tpu.memory_space<vmem>>, %arg8: memref<1x8x128xbf16, #tpu.memory_space<vmem>>, %arg9: memref<1x8x128xbf16, #tpu.memory_space<vmem>>) attributes {dimension_semantics = [#tpu.dimension_semantics<parallel>, #tpu.dimension_semantics<parallel>], iteration_bounds = array<i64: 2, 1>, scalar_prefetch = 0 : i64, scratch_operands = 0 : i64, tpu.core_type = #tpu.core_type<tc>, window_params = [{transform_indices = @transform_0, window_bounds = array<i64: 1, 8, 128>}, {transform_indices = @transform_1, window_bounds = array<i64: 1, 8, 128>}, {pipeline_mode = #tpu.pipeline_mode<synchronous>, transform_indices = @transform_2, window_bounds = array<i64: 128, 128>}, {pipeline_mode = #tpu.pipeline_mode<synchronous>, transform_indices = @transform_3, window_bounds = array<i64: 128, 128>}, {pipeline_mode = #tpu.pipeline_mode<synchronous>, transform_indices = @transform_4, window_bounds = array<i64: 1, 128>}, {pipeline_mode = #tpu.pipeline_mode<synchronous>, transform_indices = @transform_5, window_bounds = array<i64: 1, 128>}, {transform_indices = @transform_6, window_bounds = array<i64: 1, 8, 128>}, {transform_indices = @transform_7, window_bounds = array<i64: 1, 8, 128>}]} {
    %c0 = arith.constant 0 : index
    %c0_0 = arith.constant 0 : index
    %c0_1 = arith.constant 0 : index
    %0 = vector.load %arg2[%c0, %c0_0, %c0_1] : memref<1x8x128xbf16, #tpu.memory_space<vmem>>, vector<1x8x128xbf16>
    %1 = vector.shape_cast %0 : vector<1x8x128xbf16> to vector<8x128xbf16>
    %c0_2 = arith.constant 0 : index
    %c0_3 = arith.constant 0 : index
    %2 = vector.load %arg4[%c0_2, %c0_3] : memref<128x128xbf16, #tpu.memory_space<vmem>>, vector<128x128xbf16>
    %cst = arith.constant dense<0.000000e+00> : vector<8x128xf32>
    %3 = tpu.matmul %1, %2, %cst {dimension_numbers = #tpu.dot_dimension_numbers<[1], [0], [0], [1], [0, 0, 1, 1], [], []>} : vector<8x128xbf16>, vector<128x128xbf16>, vector<8x128xf32> -> vector<8x128xf32>
    %c0_4 = arith.constant 0 : index
    %c0_5 = arith.constant 0 : index
    %4 = vector.load %arg6[%c0_4, %c0_5] : memref<1x128xf32, #tpu.memory_space<vmem>>, vector<1x128xf32>
    %5 = vector.broadcast %4 : vector<1x128xf32> to vector<8x128xf32>
    %6 = arith.addf %3, %5 : vector<8x128xf32>
    %7 = arith.truncf %6 : vector<8x128xf32> to vector<8x128xbf16>
    %c0_6 = arith.constant 0 : index
    %c0_7 = arith.constant 0 : index
    %c0_8 = arith.constant 0 : index
    %8 = vector.load %arg8[%c0_6, %c0_7, %c0_8] : memref<1x8x128xbf16, #tpu.memory_space<vmem>>, vector<1x8x128xbf16>
    %9 = vector.shape_cast %8 : vector<1x8x128xbf16> to vector<8x128xbf16>
    %10 = vector.shape_cast %7 : vector<8x128xbf16> to vector<1x8x128xbf16>
    tpu.vector_store %arg8[%c0_6, %c0_7, %c0_8], %10 {strides = array<i32>} : memref<1x8x128xbf16, #tpu.memory_space<vmem>>, vector<1x8x128xbf16>,
    %c0_9 = arith.constant 0 : index
    %c0_10 = arith.constant 0 : index
    %c0_11 = arith.constant 0 : index
    %11 = vector.load %arg3[%c0_9, %c0_10, %c0_11] : memref<1x8x128xbf16, #tpu.memory_space<vmem>>, vector<1x8x128xbf16>
    %12 = vector.shape_cast %11 : vector<1x8x128xbf16> to vector<8x128xbf16>
    %c0_12 = arith.constant 0 : index
    %c0_13 = arith.constant 0 : index
    %13 = vector.load %arg5[%c0_12, %c0_13] : memref<128x128xbf16, #tpu.memory_space<vmem>>, vector<128x128xbf16>
    %cst_14 = arith.constant dense<0.000000e+00> : vector<8x128xf32>
    %14 = tpu.matmul %12, %13, %cst_14 {dimension_numbers = #tpu.dot_dimension_numbers<[1], [0], [0], [1], [0, 0, 1, 1], [], []>} : vector<8x128xbf16>, vector<128x128xbf16>, vector<8x128xf32> -> vector<8x128xf32>
    %c0_15 = arith.constant 0 : index
    %c0_16 = arith.constant 0 : index
    %15 = vector.load %arg7[%c0_15, %c0_16] : memref<1x128xf32, #tpu.memory_space<vmem>>, vector<1x128xf32>
    %16 = vector.broadcast %15 : vector<1x128xf32> to vector<8x128xf32>
    %17 = arith.addf %14, %16 : vector<8x128xf32>
    %18 = arith.truncf %17 : vector<8x128xf32> to vector<8x128xbf16>
    %c0_17 = arith.constant 0 : index
    %c0_18 = arith.constant 0 : index
    %c0_19 = arith.constant 0 : index
    %19 = vector.load %arg9[%c0_17, %c0_18, %c0_19] : memref<1x8x128xbf16, #tpu.memory_space<vmem>>, vector<1x8x128xbf16>
    %20 = vector.shape_cast %19 : vector<1x8x128xbf16> to vector<8x128xbf16>
    %21 = vector.shape_cast %18 : vector<8x128xbf16> to vector<1x8x128xbf16>
    tpu.vector_store %arg9[%c0_17, %c0_18, %c0_19], %21 {strides = array<i32>} : memref<1x8x128xbf16, #tpu.memory_space<vmem>>, vector<1x8x128xbf16>,
    return
  }
  func.func @transform_0(%arg0: i32, %arg1: i32) -> (i32, i32, i32) {
    %c0_i32 = arith.constant 0 : i32
    %c0_i32_0 = arith.constant 0 : i32
    return %arg0, %arg1, %c0_i32 : i32, i32, i32
  }
  func.func @transform_1(%arg0: i32, %arg1: i32) -> (i32, i32, i32) {
    %c0_i32 = arith.constant 0 : i32
    %c0_i32_0 = arith.constant 0 : i32
    return %arg0, %arg1, %c0_i32 : i32, i32, i32
  }
  func.func @transform_2(%arg0: i32, %arg1: i32) -> (i32, i32) {
    %c0_i32 = arith.constant 0 : i32
    %c0_i32_0 = arith.constant 0 : i32
    %c0_i32_1 = arith.constant 0 : i32
    return %c0_i32, %c0_i32_0 : i32, i32
  }
  func.func @transform_3(%arg0: i32, %arg1: i32) -> (i32, i32) {
    %c0_i32 = arith.constant 0 : i32
    %c0_i32_0 = arith.constant 0 : i32
    %c0_i32_1 = arith.constant 0 : i32
    return %c0_i32, %c0_i32_0 : i32, i32
  }
  func.func @transform_4(%arg0: i32, %arg1: i32) -> (i32, i32) {
    %c0_i32 = arith.constant 0 : i32
    %c0_i32_0 = arith.constant 0 : i32
    %c0_i32_1 = arith.constant 0 : i32
    return %c0_i32, %c0_i32_0 : i32, i32
  }
  func.func @transform_5(%arg0: i32, %arg1: i32) -> (i32, i32) {
    %c0_i32 = arith.constant 0 : i32
    %c0_i32_0 = arith.constant 0 : i32
    %c0_i32_1 = arith.constant 0 : i32
    return %c0_i32, %c0_i32_0 : i32, i32
  }
  func.func @transform_6(%arg0: i32, %arg1: i32) -> (i32, i32, i32) {
    %c0_i32 = arith.constant 0 : i32
    %c0_i32_0 = arith.constant 0 : i32
    return %arg0, %arg1, %c0_i32 : i32, i32, i32
  }
  func.func @transform_7(%arg0: i32, %arg1: i32) -> (i32, i32, i32) {
    %c0_i32 = arith.constant 0 : i32
    %c0_i32_0 = arith.constant 0 : i32
    return %arg0, %arg1, %c0_i32 : i32, i32, i32
  }
}

module attributes {stable_mosaic.version = 11 : i64} {
  func.func @_flash_kernel(%arg0: i32, %arg1: i32, %arg2: i32, %arg3: memref<1x8x128xbf16, #tpu.memory_space<vmem>>, %arg4: memref<128x128xbf16, #tpu.memory_space<vmem>>, %arg5: memref<1x128xf32, #tpu.memory_space<vmem>>, %arg6: memref<1x8x128xbf16, #tpu.memory_space<vmem>>, %arg7: memref<1x8x128xbf16, #tpu.memory_space<vmem>>, %arg8: memref<1x8x128xf32, #tpu.memory_space<vmem>>, %arg9: memref<8x128xbf16, #tpu.memory_space<vmem>>, %arg10: memref<8x128xf32, #tpu.memory_space<vmem>>, %arg11: memref<8x128xf32, #tpu.memory_space<vmem>>, %arg12: memref<8x128xf32, #tpu.memory_space<vmem>>) attributes {dimension_semantics = [#tpu.dimension_semantics<parallel>, #tpu.dimension_semantics<parallel>, #tpu.dimension_semantics<arbitrary>], iteration_bounds = array<i64: 2, 1, 1>, scalar_prefetch = 0 : i64, scratch_operands = 4 : i64, tpu.core_type = #tpu.core_type<tc>, window_params = [{transform_indices = @transform_0, window_bounds = array<i64: 1, 8, 128>}, {pipeline_mode = #tpu.pipeline_mode<synchronous>, transform_indices = @transform_1, window_bounds = array<i64: 128, 128>}, {pipeline_mode = #tpu.pipeline_mode<synchronous>, transform_indices = @transform_2, window_bounds = array<i64: 1, 128>}, {transform_indices = @transform_3, window_bounds = array<i64: 1, 8, 128>}, {transform_indices = @transform_4, window_bounds = array<i64: 1, 8, 128>}, {transform_indices = @transform_5, window_bounds = array<i64: 1, 8, 128>}]} {
    %c0_i32 = arith.constant 0 : i32
    %0 = arith.cmpi eq, %arg2, %c0_i32 : i32
    %1 = arith.extui %0 : i1 to i32
    %c0_i32_0 = arith.constant 0 : i32
    %2 = arith.cmpi ne, %1, %c0_i32_0 : i32
    scf.if %2 {
      %c0_25 = arith.constant 0 : index
      %c0_26 = arith.constant 0 : index
      %c0_27 = arith.constant 0 : index
      %39 = vector.load %arg3[%c0_25, %c0_26, %c0_27] : memref<1x8x128xbf16, #tpu.memory_space<vmem>>, vector<1x8x128xbf16>
      %40 = vector.shape_cast %39 : vector<1x8x128xbf16> to vector<8x128xbf16>
      %c0_28 = arith.constant 0 : index
      %c0_29 = arith.constant 0 : index
      %41 = vector.load %arg4[%c0_28, %c0_29] : memref<128x128xbf16, #tpu.memory_space<vmem>>, vector<128x128xbf16>
      %cst_30 = arith.constant dense<0.000000e+00> : vector<8x128xf32>
      %42 = tpu.matmul %40, %41, %cst_30 {dimension_numbers = #tpu.dot_dimension_numbers<[1], [0], [0], [1], [0, 0, 1, 1], [], []>} : vector<8x128xbf16>, vector<128x128xbf16>, vector<8x128xf32> -> vector<8x128xf32>
      %c0_31 = arith.constant 0 : index
      %c0_32 = arith.constant 0 : index
      %43 = vector.load %arg5[%c0_31, %c0_32] : memref<1x128xf32, #tpu.memory_space<vmem>>, vector<1x128xf32>
      %44 = vector.broadcast %43 : vector<1x128xf32> to vector<8x128xf32>
      %45 = arith.addf %42, %44 : vector<8x128xf32>
      %46 = arith.truncf %45 : vector<8x128xf32> to vector<8x128xbf16>
      %c0_33 = arith.constant 0 : index
      %c0_34 = arith.constant 0 : index
      %47 = vector.load %arg9[%c0_33, %c0_34] : memref<8x128xbf16, #tpu.memory_space<vmem>>, vector<8x128xbf16>
      tpu.vector_store %arg9[%c0_33, %c0_34], %46 {strides = array<i32>} : memref<8x128xbf16, #tpu.memory_space<vmem>>, vector<8x128xbf16>,
      %cst_35 = arith.constant 0xFF800000 : f32
      %48 = vector.broadcast %cst_35 : f32 to vector<8x128xf32>
      %c0_36 = arith.constant 0 : index
      %c0_37 = arith.constant 0 : index
      %49 = vector.load %arg10[%c0_36, %c0_37] : memref<8x128xf32, #tpu.memory_space<vmem>>, vector<8x128xf32>
      tpu.vector_store %arg10[%c0_36, %c0_37], %48 {strides = array<i32>} : memref<8x128xf32, #tpu.memory_space<vmem>>, vector<8x128xf32>,
      %cst_38 = arith.constant 0.000000e+00 : f32
      %50 = vector.broadcast %cst_38 : f32 to vector<8x128xf32>
      %c0_39 = arith.constant 0 : index
      %c0_40 = arith.constant 0 : index
      %51 = vector.load %arg11[%c0_39, %c0_40] : memref<8x128xf32, #tpu.memory_space<vmem>>, vector<8x128xf32>
      tpu.vector_store %arg11[%c0_39, %c0_40], %50 {strides = array<i32>} : memref<8x128xf32, #tpu.memory_space<vmem>>, vector<8x128xf32>,
      %cst_41 = arith.constant 0.000000e+00 : f32
      %52 = vector.broadcast %cst_41 : f32 to vector<8x128xf32>
      %c0_42 = arith.constant 0 : index
      %c0_43 = arith.constant 0 : index
      %53 = vector.load %arg12[%c0_42, %c0_43] : memref<8x128xf32, #tpu.memory_space<vmem>>, vector<8x128xf32>
      tpu.vector_store %arg12[%c0_42, %c0_43], %52 {strides = array<i32>} : memref<8x128xf32, #tpu.memory_space<vmem>>, vector<8x128xf32>,
    } else {
    }
    %c0 = arith.constant 0 : index
    %c0_1 = arith.constant 0 : index
    %3 = vector.load %arg9[%c0, %c0_1] : memref<8x128xbf16, #tpu.memory_space<vmem>>, vector<8x128xbf16>
    %c0_2 = arith.constant 0 : index
    %c0_3 = arith.constant 0 : index
    %c0_4 = arith.constant 0 : index
    %4 = vector.load %arg6[%c0_2, %c0_3, %c0_4] : memref<1x8x128xbf16, #tpu.memory_space<vmem>>, vector<1x8x128xbf16>
    %5 = vector.shape_cast %4 : vector<1x8x128xbf16> to vector<8x128xbf16>
    %cst = arith.constant dense<0.000000e+00> : vector<8x8xf32>
    %6 = tpu.matmul %3, %5, %cst {dimension_numbers = #tpu.dot_dimension_numbers<[1], [1], [0], [0], [0, 0, 1, 0], [], []>} : vector<8x128xbf16>, vector<8x128xbf16>, vector<8x8xf32> -> vector<8x8xf32>
    %c0_5 = arith.constant 0 : index
    %c0_6 = arith.constant 0 : index
    %7 = vector.load %arg10[%c0_5, %c0_6] : memref<8x128xf32, #tpu.memory_space<vmem>>, vector<8x128xf32>
    %cst_7 = arith.constant dense<0xFF800000> : vector<8xf32>
    %8 = vector.multi_reduction <maximumf>, %6, %cst_7 [1] : vector<8x8xf32> to vector<8xf32>
    %9 = vector.shape_cast %8 : vector<8xf32> to vector<8x1xf32>
    %10 = vector.broadcast %9 : vector<8x1xf32> to vector<8x128xf32>
    %11 = arith.maximumf %7, %10 : vector<8x128xf32>
    %12 = arith.subf %7, %11 : vector<8x128xf32>
    %13 = math.exp %12 : vector<8x128xf32>
    %14 = vector.extract_strided_slice %11 {offsets = [0, 0], sizes = [8, 1], strides = [1, 1]} : vector<8x128xf32> to vector<8x1xf32>
    %15 = vector.broadcast %14 : vector<8x1xf32> to vector<8x8xf32>
    %16 = arith.subf %6, %15 : vector<8x8xf32>
    %17 = math.exp %16 : vector<8x8xf32>
    %c0_8 = arith.constant 0 : index
    %c0_9 = arith.constant 0 : index
    %18 = vector.load %arg11[%c0_8, %c0_9] : memref<8x128xf32, #tpu.memory_space<vmem>>, vector<8x128xf32>
    %19 = arith.mulf %13, %18 : vector<8x128xf32>
    %cst_10 = arith.constant dense<0.000000e+00> : vector<8xf32>
    %20 = vector.multi_reduction <add>, %17, %cst_10 [1] : vector<8x8xf32> to vector<8xf32>
    %21 = vector.shape_cast %20 : vector<8xf32> to vector<8x1xf32>
    %22 = vector.broadcast %21 : vector<8x1xf32> to vector<8x128xf32>
    %23 = arith.addf %19, %22 : vector<8x128xf32>
    %c0_11 = arith.constant 0 : index
    %c0_12 = arith.constant 0 : index
    %24 = vector.load %arg11[%c0_11, %c0_12] : memref<8x128xf32, #tpu.memory_space<vmem>>, vector<8x128xf32>
    tpu.vector_store %arg11[%c0_11, %c0_12], %23 {strides = array<i32>} : memref<8x128xf32, #tpu.memory_space<vmem>>, vector<8x128xf32>,
    %25 = vector.extract_strided_slice %13 {offsets = [0, 0], sizes = [8, 1], strides = [1, 1]} : vector<8x128xf32> to vector<8x1xf32>
    %c0_13 = arith.constant 0 : index
    %c0_14 = arith.constant 0 : index
    %26 = vector.load %arg12[%c0_13, %c0_14] : memref<8x128xf32, #tpu.memory_space<vmem>>, vector<8x128xf32>
    %27 = vector.broadcast %25 : vector<8x1xf32> to vector<8x128xf32>
    %28 = arith.mulf %27, %26 : vector<8x128xf32>
    %29 = arith.truncf %17 : vector<8x8xf32> to vector<8x8xbf16>
    %c0_15 = arith.constant 0 : index
    %c0_16 = arith.constant 0 : index
    %c0_17 = arith.constant 0 : index
    %30 = vector.load %arg7[%c0_15, %c0_16, %c0_17] : memref<1x8x128xbf16, #tpu.memory_space<vmem>>, vector<1x8x128xbf16>
    %31 = vector.shape_cast %30 : vector<1x8x128xbf16> to vector<8x128xbf16>
    %cst_18 = arith.constant dense<0.000000e+00> : vector<8x128xf32>
    %32 = tpu.matmul %29, %31, %cst_18 {dimension_numbers = #tpu.dot_dimension_numbers<[1], [0], [0], [1], [0, 0, 1, 1], [], []>} : vector<8x8xbf16>, vector<8x128xbf16>, vector<8x128xf32> -> vector<8x128xf32>
    %33 = arith.addf %28, %32 : vector<8x128xf32>
    %c0_19 = arith.constant 0 : index
    %c0_20 = arith.constant 0 : index
    %34 = vector.load %arg12[%c0_19, %c0_20] : memref<8x128xf32, #tpu.memory_space<vmem>>, vector<8x128xf32>
    tpu.vector_store %arg12[%c0_19, %c0_20], %33 {strides = array<i32>} : memref<8x128xf32, #tpu.memory_space<vmem>>, vector<8x128xf32>,
    %c0_21 = arith.constant 0 : index
    %c0_22 = arith.constant 0 : index
    %35 = vector.load %arg10[%c0_21, %c0_22] : memref<8x128xf32, #tpu.memory_space<vmem>>, vector<8x128xf32>
    tpu.vector_store %arg10[%c0_21, %c0_22], %11 {strides = array<i32>} : memref<8x128xf32, #tpu.memory_space<vmem>>, vector<8x128xf32>,
    %c0_i32_23 = arith.constant 0 : i32
    %36 = arith.cmpi eq, %arg2, %c0_i32_23 : i32
    %37 = arith.extui %36 : i1 to i32
    %c0_i32_24 = arith.constant 0 : i32
    %38 = arith.cmpi ne, %37, %c0_i32_24 : i32
    scf.if %38 {
      %c0_25 = arith.constant 0 : index
      %c0_26 = arith.constant 0 : index
      %39 = vector.load %arg11[%c0_25, %c0_26] : memref<8x128xf32, #tpu.memory_space<vmem>>, vector<8x128xf32>
      %40 = tpu.reciprocal %39 {approx = true} : vector<8x128xf32> -> vector<8x128xf32>
      %c0_27 = arith.constant 0 : index
      %c0_28 = arith.constant 0 : index
      %41 = vector.load %arg12[%c0_27, %c0_28] : memref<8x128xf32, #tpu.memory_space<vmem>>, vector<8x128xf32>
      %42 = vector.extract_strided_slice %40 {offsets = [0, 0], sizes = [8, 1], strides = [1, 1]} : vector<8x128xf32> to vector<8x1xf32>
      %43 = vector.broadcast %42 : vector<8x1xf32> to vector<8x128xf32>
      %44 = arith.mulf %41, %43 : vector<8x128xf32>
      %c0_29 = arith.constant 0 : index
      %c0_30 = arith.constant 0 : index
      %c0_31 = arith.constant 0 : index
      %45 = vector.load %arg8[%c0_29, %c0_30, %c0_31] : memref<1x8x128xf32, #tpu.memory_space<vmem>>, vector<1x8x128xf32>
      %46 = vector.shape_cast %45 : vector<1x8x128xf32> to vector<8x128xf32>
      %47 = vector.shape_cast %44 : vector<8x128xf32> to vector<1x8x128xf32>
      tpu.vector_store %arg8[%c0_29, %c0_30, %c0_31], %47 {strides = array<i32>} : memref<1x8x128xf32, #tpu.memory_space<vmem>>, vector<1x8x128xf32>,
    } else {
    }
    return
  }
  func.func @transform_0(%arg0: i32, %arg1: i32, %arg2: i32) -> (i32, i32, i32) {
    %c0_i32 = arith.constant 0 : i32
    %c0_i32_0 = arith.constant 0 : i32
    return %arg0, %arg1, %c0_i32 : i32, i32, i32
  }
  func.func @transform_1(%arg0: i32, %arg1: i32, %arg2: i32) -> (i32, i32) {
    %c0_i32 = arith.constant 0 : i32
    %c0_i32_0 = arith.constant 0 : i32
    %c0_i32_1 = arith.constant 0 : i32
    return %c0_i32, %c0_i32_0 : i32, i32
  }
  func.func @transform_2(%arg0: i32, %arg1: i32, %arg2: i32) -> (i32, i32) {
    %c0_i32 = arith.constant 0 : i32
    %c0_i32_0 = arith.constant 0 : i32
    %c0_i32_1 = arith.constant 0 : i32
    return %c0_i32, %c0_i32_0 : i32, i32
  }
  func.func @transform_3(%arg0: i32, %arg1: i32, %arg2: i32) -> (i32, i32, i32) {
    %c0_i32 = arith.constant 0 : i32
    %c0_i32_0 = arith.constant 0 : i32
    return %arg0, %arg2, %c0_i32 : i32, i32, i32
  }
  func.func @transform_4(%arg0: i32, %arg1: i32, %arg2: i32) -> (i32, i32, i32) {
    %c0_i32 = arith.constant 0 : i32
    %c0_i32_0 = arith.constant 0 : i32
    return %arg0, %arg2, %c0_i32 : i32, i32, i32
  }
  func.func @transform_5(%arg0: i32, %arg1: i32, %arg2: i32) -> (i32, i32, i32) {
    %c0_i32 = arith.constant 0 : i32
    %c0_i32_0 = arith.constant 0 : i32
    return %arg0, %arg1, %c0_i32 : i32, i32, i32
  }
}

</mosaic_0001>

<bundles_post_ra>
// kernel: attention_forward.2
= control target key start
LH: loop header
LB: loop body
LE: loop exit
PB: predicated region body
PF: predicated region fallthrough
CT: control target
= control target key end

     0   :  { %s906_s24 = smov 0   ;;  %s908_s25 = smov 0   ;;  %s1009_s0 = inlined_call_operand.vmem [shape: bf16[2,8,128], index: 0, kind: input, shape index: {}]   ;;  %s1010_s1 = inlined_call_operand.vmem [shape: bf16[2,8,128], index: 1, kind: input, shape index: {}]   ;;  %s1011_s2 = inlined_call_operand.vmem [shape: bf16[128,128], index: 2, kind: input, shape index: {}]   ;;  %s1012_s3 = inlined_call_operand.vmem [shape: bf16[128,128], index: 3, kind: input, shape index: {}]   ;;  %s1013_s4 = inlined_call_operand.vmem [shape: f32[1,128], index: 4, kind: input, shape index: {}]   ;;  %s1014_s5 = inlined_call_operand.vmem [shape: f32[1,128], index: 5, kind: input, shape index: {}]   ;;  %s1015_s6 = inlined_call_operand.vmem [shape: bf16[2,8,128], index: 6, kind: output, shape index: {0}]   ;;  %s1016_s7 = inlined_call_operand.vmem [shape: bf16[2,8,128], index: 7, kind: output, shape index: {1}]  }
   0x1   :  { %s910_s26 = smov 0  }
   0x2 LB: > { %s30_s27 = sadd.s32 1, %s858_s25  ;;  %p715_p0 = scmp.ge.s32.totalorder %s862_s26, 1  ;;  %s862_s26 = sphi %s910_s26, %s18_s26   ;;  %s858_s25 = sphi %s908_s25, %s1018_s25   ;;  %s854_s24 = sphi %s906_s24, %s1017_s24  }
   0x3   : > { %p32_p1 = scmp.ge.s32.totalorder %s30_s27, 2  ;;  %p274_p2 = scmp.lt.s32.totalorder %s862_s26, 3 }
   0x5   : > { %s1020_s27 = smov (%p32_p1, %s30_s27), 0  ;;  %p275_p3 = pnand %p715_p0, %p274_p2 }
   0x6   : > { %p324_p4 = scmp.lt.s32.totalorder (!%p275_p3), %s854_s24, 1 }
   0x7   : > { %278 = sbr.rel (%p275_p3) target bundleno = 245 (0xf5), region = 44 }
   0xc   : > { %v824_v0 = vld [vmem:[%s1011_s2 + $0x38] sm:$0xff]   ;;  %v864_v1 = vmov 0.0   ;;  %v826_v3 = vld [vmem:[%s1011_s2 + $0x30] sm:$0xff]   ;;  %vm865_vm0 = vmmov 0   ;;  %v828_v5 = vld [vmem:[%s1011_s2 + $0x28] sm:$0xff]   ;;  %s1022_s24 = smov (!%p324_p4, %s854_s24), 1 }
   0xd   : > { %758 = vmatprep.subr.bf16.mxu0 %v864_v1  ;;  %778 = vmatprep.subr.bf16.mxu1 %v864_v1  ;;  %v825_v2 = vld [vmem:[%s1012_s3 + $0x38] sm:$0xff]   ;;  %v827_v4 = vld [vmem:[%s1012_s3 + $0x30] sm:$0xff]   ;;  %v829_v6 = vld [vmem:[%s1012_s3 + $0x28] sm:$0xff]   ;;  %s970_s14 = sshll.u32 %s1022_s24, 2 }
   0xe   : > { %759 = vmatpush3.bf16.msra.mxu0 %v824_v0  ;;  %774 = vmatprep.mubr.msk.bf16.mxu0 %vm865_vm0, %v864_v1  ;;  %v830_v7 = vld [vmem:[%s1011_s2 + $0x20] sm:$0xff]   ;;  %v832_v9 = vld [vmem:[%s1011_s2 + $0x18] sm:$0xff]   ;;  %v834_v11 = vld [vmem:[%s1011_s2 + $0x10] sm:$0xff]   ;;  %s330_s21 = scalar_lea.vmem %s1009_s0, %s970_s14  ;;  %s337_s23 = scalar_lea.vmem %s1010_s1, %s970_s14 }
   0xf   : > { %779 = vmatpush3.bf16.msra.mxu1 %v825_v2  ;;  %760 = vmatprep.subr.bf16.mxu0 %v864_v1  ;;  %v831_v8 = vld [vmem:[%s1012_s3 + $0x20] sm:$0xff]   ;;  %v833_v10 = vld [vmem:[%s1012_s3 + $0x18] sm:$0xff]   ;;  %v835_v12 = vld [vmem:[%s1012_s3 + $0x10] sm:$0xff]   ;;  %s344_s11 = scalar_lea.vmem %s1015_s6, %s970_s14  ;;  %s351_s15 = scalar_lea.vmem %s1016_s7, %s970_s14 }
  0x10   : > { %780 = vmatprep.subr.bf16.mxu1 %v864_v1  ;;  %794 = vmatprep.mubr.msk.bf16.mxu1 %vm865_vm0, %v864_v1  ;;  %v836_v13 = vld [vmem:[%s1011_s2 + $0x8] sm:$0xff]   ;;  %v838_v15 = vld [vmem:[%s1011_s2] sm:$0xff]  }
  0x11   : > { %v837_v14 = vld [vmem:[%s1012_s3 + $0x8] sm:$0xff]   ;;  %v839_v16 = vld [vmem:[%s1012_s3] sm:$0xff]  }
  0x12   : > { %761 = vmatpush3.bf16.msra.mxu0 %v826_v3  ;;  %v353_v17 = vld [vmem:[%s330_s21] sm:$0xf] }
  0x13   : > { %781 = vmatpush3.bf16.msra.mxu1 %v827_v4  ;;  %762 = vmatprep.subr.bf16.mxu0 %v864_v1  ;;  %v467_v18 = vld [vmem:[%s337_s23] sm:$0xf] }
  0x14   : > { %782 = vmatprep.subr.bf16.mxu1 %v864_v1  ;;  %v720_v19 = vld [vmem:[%s1013_s4] ss:$0 sm:$0xff] }
  0x15   : > { %v729_v20 = vld [vmem:[%s1014_s5] ss:$0 sm:$0xff] }
  0x16   : > { %763 = vmatpush3.bf16.msra.mxu0 %v828_v5 }
  0x17   : > { %783 = vmatpush3.bf16.msra.mxu1 %v829_v6  ;;  %764 = vmatprep.subr.bf16.mxu0 %v864_v1 }
  0x18   : > { %784 = vmatprep.subr.bf16.mxu1 %v864_v1 }
  0x1a   : > { %765 = vmatpush3.bf16.msra.mxu0 %v830_v7 }
  0x1b   : > { %785 = vmatpush3.bf16.msra.mxu1 %v831_v8  ;;  %766 = vmatprep.subr.bf16.mxu0 %v864_v1 }
  0x1c   : > { %786 = vmatprep.subr.bf16.mxu1 %v864_v1 }
  0x1e   : > { %767 = vmatpush3.bf16.msra.mxu0 %v832_v9 }
  0x1f   : > { %787 = vmatpush3.bf16.msra.mxu1 %v833_v10  ;;  %768 = vmatprep.subr.bf16.mxu0 %v864_v1 }
  0x20   : > { %788 = vmatprep.subr.bf16.mxu1 %v864_v1 }
  0x22   : > { %769 = vmatpush3.bf16.msra.mxu0 %v834_v11 }
  0x23   : > { %789 = vmatpush3.bf16.msra.mxu1 %v835_v12  ;;  %770 = vmatprep.subr.bf16.mxu0 %v864_v1 }
  0x24   : > { %790 = vmatprep.subr.bf16.mxu1 %v864_v1 }
  0x26   : > { %771 = vmatpush3.bf16.msra.mxu0 %v836_v13 }
  0x27   : > { %791 = vmatpush3.bf16.msra.mxu1 %v837_v14  ;;  %772 = vmatprep.subr.bf16.mxu0 %v864_v1 }
  0x28   : > { %792 = vmatprep.subr.bf16.mxu1 %v864_v1 }
  0x2a   : > { %773 = vmatpush3.bf16.msra.mxu0 %v838_v15 }
  0x2b   : > { %793 = vmatpush3.bf16.msra.mxu1 %v839_v16 }
  0x2d   : > { %775 = vmatmul.mubr.bf16.vlgmr.msra.gmra.mxu0 %v353_v17 }
  0x2e   : > { %795 = vmatmul.mubr.bf16.vlgmr.msra.gmra.mxu1 %v467_v18 }
  0xed   : > { %v459_v21 = vpop.f32.mrf.mxu0 }
  0xee   : > { %v460_v22 = vadd.f32 %v720_v19, %v459_v21  ;;  %v573_v23 = vpop.f32.mrf.mxu1 }
  0xef   : > { %v574_v24 = vadd.f32 %v729_v20, %v573_v23  ;;  %v776_v25 = vpop.f32.mrf.mxu0 }
  0xf0   : > { %v465_v26 = vpack.c.bf16 %v460_v22, %v460_v22  ;;  %v796_v27 = vpop.f32.mrf.mxu1 }
  0xf1   : > { %v579_v28 = vpack.c.bf16 %v574_v24, %v574_v24  ;;  %v462_v29 = vpop.f32.mrf.mxu0 }
  0xf2   : > { %466 = vst [vmem:[%s344_s11] sm:$0xf] %v465_v26  ;;  %v576_v30 = vpop.f32.mrf.mxu1 }
  0xf3   : > { %580 = vst [vmem:[%s351_s15] sm:$0xf] %v579_v28  ;;  %v777_v31 = vpop.f32.mrf.mxu0 }
  0xf4   : > { %v797_v32 = vpop.f32.mrf.mxu1 }
  0xf5 PF: > { %s18_s26 = sadd.s32 1, %s862_s26   ;;  %s1017_s24 = smov %s858_s25 }
  0xf6   : > { %p15_p5 = scmp.ge.s32.totalorder %s18_s26, 4   ;;  %s1018_s25 = smov %s1020_s27 }
  0xf8   :  { %17 = sbr.rel (!%p15_p5) target bundleno = 2 (0x2), region = 89 }

// kernel: attention_forward.3
= control target key start
LH: loop header
LB: loop body
LE: loop exit
PB: predicated region body
PF: predicated region fallthrough
CT: control target
= control target key end

     0   :  { %10 = vsyncpa [#allocation7], 0  ;;  %s1084_s0 = inlined_call_operand.vmem [shape: bf16[2,8,128], index: 0, kind: input, shape index: {}]   ;;  %s1085_s1 = inlined_call_operand.vmem [shape: bf16[128,128], index: 1, kind: input, shape index: {}]   ;;  %s1086_s2 = inlined_call_operand.vmem [shape: f32[1,128], index: 2, kind: input, shape index: {}]   ;;  %s1087_s3 = inlined_call_operand.vmem [shape: bf16[2,8,128], index: 3, kind: input, shape index: {}]   ;;  %s1088_s4 = inlined_call_operand.vmem [shape: bf16[2,8,128], index: 4, kind: input, shape index: {}]   ;;  %s1089_s5 = inlined_call_operand.hbm [shape: f32[2,8,128], index: 5, kind: output, shape index: {}]  }
   0x1   :  { %12 = vsyncpa [#allocation7 + $0x1], 0  ;;  %s941_s18 = smov 0   ;;  %s943_s19 = smov 0  }
   0x2   :  { %s945_s20 = smov 0   ;;  %s947_s21 = smov 0  }
   0x3   :  { %s949_s22 = smov 0   ;;  %s951_s23 = smov 0  }
   0x4 LB: > { %s687_s24 = sadd.s32 4294967295, %s905_s23   ;;  %s688_s25 = sadd.s32 4294967294, %s905_s23   ;;  %s905_s23 = sphi %s951_s23, %s18_s23   ;;  %s901_s22 = sphi %s949_s22, %s1096_s22   ;;  %s897_s21 = sphi %s947_s21, %s1095_s21   ;;  %s893_s20 = sphi %s945_s20, %s1094_s20   ;;  %s889_s19 = sphi %s943_s19, %s1093_s19   ;;  %s885_s18 = sphi %s941_s18, %s1092_s18  }
   0x5   : > { %s37_s26 = sadd.s32 1, %s901_s22  ;;  %s172_s27 = sadd.s32 1, %s893_s20 }
   0x6   : > { %p39_p0 = scmp.ge.s32.totalorder %s37_s26, 2  ;;  %p182_p1 = scmp.ne.s32.totalorder %s893_s20, %s889_s19 }
   0x7   : > { %p183_p2 = scmp.eq.s32.totalorder %s687_s24, 1  ;;  %p188_p3 = scmp.ne.s32.totalorder %s889_s19, %s885_s18 }
   0x8   : > { %s1098_s26 = smov (%p39_p0, %s37_s26), 0  ;;  %p189_p5 = scmp.eq.s32.totalorder %s688_s25, 1 }
   0x9   : > { %p981_p4 = por %p183_p2, %p182_p1  ;;  %s167_s29 = ssub.s32 %s901_s22, %s1098_s26 }
   0xa   : > { %p691_p6 = scmp.ge.s32.totalorder %s905_s23, 1  ;;  %p170_p7 = scmp.eq.s32.totalorder %s167_s29, 0 }
   0xb   : > { %p988_p8 = por %p189_p5, %p188_p3  ;;  %p243_p9 = scmp.lt.s32.totalorder %s905_s23, 3 }
   0xc   : > { %s994_s6 = scalar_select %p170_p7, %s893_s20, %s172_s27  }
   0xd   : > { %p244_p10 = pnand %p691_p6, %p243_p9 }
   0xe   : > { %p287_p11 = scmp.lt.s32.totalorder (!%p244_p10), %s897_s21, 1  ;;  %s284_s29 = sand.u32 (!%p244_p10), 1, %s889_s19  }
   0xf   : > { %247 = sbr.rel (%p244_p10) target bundleno = 1026 (0x402), region = 40  ;;  %s707_s8 = sshll.u32 (!%p244_p10), %s897_s21, 7 }
  0x10   : > { %s581_s13 = scalar_lea.hbm (!%p244_p10), %s1089_s5, %s707_s8  ;;  %s569_s14 = scalar_lea.sflag (!%p244_p10), [#allocation7], %s284_s29 }
  0x11   : > { %s910_s16 = smov (!%p244_p10), [#allocation6]  }
  0x12   : > { %s833_s17 = sshll.u32 (!%p244_p10), %s910_s16, 4  ;;  %s834_s17 = int_to_ptr.vmem [resolvable:$false] %s833_s17 }
  0x14   : > { %v815_v0 = vld [vmem:[%s1085_s1 + $0x38] sm:$0xff]   ;;  %v907_v1 = vmov 0.0   ;;  %v816_v2 = vld [vmem:[%s1085_s1 + $0x30] sm:$0xff]   ;;  %vm908_vm0 = vmmov 0   ;;  %v817_v3 = vld [vmem:[%s1085_s1 + $0x28] sm:$0xff]   ;;  %s288_s25 = scalar_select %p287_p11, %s897_s21, 1 }
  0x15   : > { %723 = vmatprep.subr.bf16.mxu0 %v907_v1  ;;  %743 = vmatprep.subr.bf16.mxu1 %v907_v1  ;;  %v818_v4 = vld [vmem:[%s1085_s1 + $0x20] sm:$0xff]   ;;  %v819_v5 = vld [vmem:[%s1085_s1 + $0x18] sm:$0xff]   ;;  %v820_v6 = vld [vmem:[%s1085_s1 + $0x10] sm:$0xff]   ;;  %v909_v19 = vmov 0   ;;  %vm473_vm1 = vcmask 64512   ;;  %vm508_vm2 = vcmask 1043456  }
  0x16   : > { %724 = vmatpush3.bf16.msra.mxu0 %v815_v0  ;;  %739 = vmatprep.mubr.msk.bf16.mxu0 %vm908_vm0, %v907_v1  ;;  %v821_v7 = vld [vmem:[%s1085_s1 + $0x8] sm:$0xff]   ;;  %s1021_s7 = sshll.u32 %s288_s25, 2  ;;  %v822_v8 = vld [vmem:[%s1085_s1] sm:$0xff]   ;;  %s835_s21 = scalar_lea.vmem %s834_s17, 256 }
  0x17   : > { %725 = vmatprep.subr.bf16.mxu0 %v907_v1  ;;  %745 = vmatprep.mubr.msk.bf16.mxu1 %vm908_vm0, %v907_v1  ;;  %s293_s12 = scalar_lea.vmem %s1084_s0, %s1021_s7  ;;  %s300_s15 = scalar_lea.vmem %s1087_s3, %s1021_s7  ;;  %v696_v11 = vld [vmem:[%s1086_s2] ss:$0 sm:$0xff] }
  0x18   : > { %v313_v9 = vld [vmem:[%s293_s12] sm:$0xf]  ;;  %813 = vset.pattern.permute.xlu0 %v909_v19  ;;  %814 = vset.pattern.permute.xlu1 %v909_v19  ;;  %s307_s27 = scalar_lea.vmem %s1088_s4, %s1021_s7  ;;  %s692_s7 = sshll.u32 %s284_s29, 3 }
  0x19   : > { %v431_v10 = vld [vmem:[%s300_s15] sm:$0xf]  ;;  %s286_s9 = scalar_lea.vmem [#allocation6], %s692_s7 }
  0x1a   : > { %726 = vmatpush3.bf16.msra.mxu0 %v816_v2  ;;  %744 = vmatpush3.bf16.xpose.msra.mxu1 %v431_v10  ;;  %v504_v26 = vld [vmem:[%s307_s27] sm:$0xf]  ;;  %s583_s10 = sshll.u32 %s286_s9, 4  ;;  %s584_s10 = int_to_ptr.vmem [resolvable:$true] %s583_s10 }
  0x1b   : > { %727 = vmatprep.subr.bf16.mxu0 %v907_v1  ;;  %749 = vmatprep.subr.bf16.mxu1 %v907_v1  ;;  %v510_v27 = vsel %vm508_vm2, %v504_v26, 0  ;;  %s829_s15 = scalar_lea.vmem %s584_s10, 128  ;;  %p836_p1 = scmp.lt.s32.totalorder %s584_s10, %s834_s17 }
  0x1c   : > { %p830_p12 = scmp.ne.s32.totalorder %s584_s10, %s829_s15  ;;  %p837_p2 = scmp.lt.s32.totalorder %s835_s21, %s829_s15 }
  0x1e   : > { %728 = vmatpush3.bf16.msra.mxu0 %v817_v3  ;;  %p831_p13 = pnand %p830_p12, %p981_p4  ;;  %p838_p3 = por %p837_p2, %p836_p1 }
  0x1f   : > { %729 = vmatprep.subr.bf16.mxu0 %v907_v1 }
  0x20   : > { %p832_p0 = pneg %p831_p13 }
  0x22   : > { %730 = vmatpush3.bf16.msra.mxu0 %v818_v4  ;;  %p839_p5 = pnand %p838_p3, %p832_p0 }
  0x23   : > { %731 = vmatprep.subr.bf16.mxu0 %v907_v1 }
  0x26   : > { %732 = vmatpush3.bf16.msra.mxu0 %v819_v5 }
  0x27   : > { %733 = vmatprep.subr.bf16.mxu0 %v907_v1 }
  0x2a   : > { %734 = vmatpush3.bf16.msra.mxu0 %v820_v6 }
  0x2b   : > { %735 = vmatprep.subr.bf16.mxu0 %v907_v1 }
  0x2e   : > { %736 = vmatpush3.bf16.msra.mxu0 %v821_v7 }
  0x2f   : > { %737 = vmatprep.subr.bf16.mxu0 %v907_v1 }
  0x32   : > { %738 = vmatpush3.bf16.msra.mxu0 %v822_v8 }
  0x35   : > { %740 = vmatmul.mubr.bf16.vlgmr.msra.gmra.mxu0 %v313_v9 }
  0xf5   : > { %v419_v12 = vpop.f32.mrf.mxu0 }
  0xf6   : > { %v420_v13 = vadd.f32 %v696_v11, %v419_v12 }
  0xf7   : > { %v741_v14 = vpop.f32.mrf.mxu0 }
  0xf8   : > { %v425_v15 = vpack.c.bf16 %v420_v13, %v420_v13 }
  0xf9   : > { %v422_v16 = vpop.f32.mrf.mxu0 }
  0xfa   : > { %426 = vst [vmem:[#allocation2] sm:$0xf] %v425_v15 }
  0xfb   : > { %v742_v17 = vpop.f32.mrf.mxu0 }
 0x101   : > { %v430_v18 = vld [vmem:[#allocation2] sm:$0xf] }
 0x102   : > { %746 = vmatmul.mubr.bf16.vlgmr.msra.gmra.mxu1 %v430_v18 }
 0x103   : > { %751 = vmatprep.mubr.msk.bf16.mxu1 %vm908_vm0, %v907_v1  ;;  %750 = vmatpush3.bf16.msra.mxu1 %v510_v27 }
 0x1c2   : > { %v466_v20 = vpop.f32.mrf.mxu1 }
 0x1c3   : > { %v474_v21 = vsel %vm473_vm1, %v466_v20, -inf }
 0x1c4   : > { %475 = vmax.xlane.f32.xlu0 %v474_v21  ;;  %v747_v22 = vpop.f32.mrf.mxu1 }
 0x1c6   : > { %v469_v23 = vpop.f32.mrf.mxu1 }
 0x1c8   : > { %v748_v24 = vpop.f32.mrf.mxu1 }
 0x24d   : > { %v476_v25 = vpop.xlane.xlu0 %475 }
 0x24e   : > { %483 = vperm.xlu0 %813, %v476_v25   ;;  %v478_v31 = vsub.f32 -inf, %v476_v25 }
 0x250   : > { %v479_v33 = vmul.f32 1.442695, %v478_v31 }
 0x2c9   : > { %v484_v28 = vpop.permute.xlu0 %483 }
 0x2ca   : > { %v486_v29 = vsub.f32 %v466_v20, %v484_v28 }
 0x2cc   : > { %v487_v30 = vmul.f32 1.442695, %v486_v29 }
 0x2ce   : > { %823 = vpow2.f32 %v487_v30 }
 0x2cf   : > { %825 = vpow2.f32 %v479_v33 }
 0x2db   : > { %v824_v32 = vpop.eup %823 }
 0x2dc   : > { %v491_v34 = vsel %vm473_vm1, %v824_v32, 0.0  ;;  %v503_v35 = vpack.c.bf16 %v824_v32, %v824_v32  ;;  %v826_v36 = vpop.eup %825 }
 0x2dd   : > { %492 = vadd.xlane.f32.xlu1 %v491_v34  ;;  %v490_v37 = vmul.f32 0.0, %v826_v36 }
 0x2de   : > { %752 = vmatmul.mubr.msk.bf16.vlgmr.msra.gmra.mxu1 %vm473_vm1, %v503_v35 }
 0x2ee   : > { %499 = vperm.xlu1 %814, %v826_v36  }
 0x366   : > { %v493_v38 = vpop.xlane.xlu1 %492 }
 0x367   : > { %v494_v39 = vadd.f32 %v493_v38, %v490_v37 }
 0x369   : > { %827 = vrcp.f32 %v494_v39 }
 0x36a   : > { %v500_v45 = vpop.permute.xlu1 %499 }
 0x36b   : > { %v502_v46 = vmul.f32 0.0, %v500_v45 }
 0x376   : > { %v828_v40 = vpop.eup %827 }
 0x377   : > { %563 = vperm.xlu1 %814, %v828_v40  }
 0x39e   : > { %v546_v41 = vpop.f32.mrf.mxu1 }
 0x39f   : > { %v552_v47 = vadd.f32 %v546_v41, %v502_v46 }
 0x3a0   : > { %v753_v42 = vpop.f32.mrf.mxu1 }
 0x3a2   : > { %v549_v43 = vpop.f32.mrf.mxu1 }
 0x3a4   : > { %v754_v44 = vpop.f32.mrf.mxu1 }
 0x3f2   : > { %v564_v48 = vpop.permute.xlu1 %563 }
 0x3f3   : > { %v566_v49 = vmul.f32 %v564_v48, %v552_v47 }
 0x3f5   : > { %567 = vst [vmem:[%s286_s9] sm:$0xff] %v566_v49 }
 0x3f6   : > { %842 = shalt.err (!%p839_p5)
}
 0x3f7   : > { %s843_s24 = scalar_lea.hbm %s581_s13, 128  ;;  %s847_s29 = scalar_lea.hbm %s1089_s5, 256 }
 0x3f8   : > { %p844_p6 = scmp.ne.s32.totalorder %s581_s13, %s843_s24  ;;  %p848_p10 = scmp.lt.s32.totalorder %s581_s13, %s1089_s5 }
 0x3f9   : > { %p849_p11 = scmp.lt.s32.totalorder %s847_s29, %s843_s24 }
 0x3fa   : > { %p845_p7 = pnand %p844_p6, %p981_p4 }
 0x3fb   : > { %p850_p12 = por %p849_p11, %p848_p10 }
 0x3fc   : > { %p846_p9 = pneg %p845_p7 }
 0x3fe   : > { %p851_p13 = pnand %p850_p12, %p846_p9 }
 0x400   : > { %854 = shalt.err (!%p851_p13)
}
 0x401   : > { %755 = dma.vmem_to_hbm [thread:$0]  (%p981_p4), %s584_s10, 128, %s581_s13, %s569_s14  }
 0x402 PF: > { %p761_p0 = scmp.ge.s32.totalorder %s905_s23, 2  ;;  %s595_s9 = sand.u32 1, %s885_s18  }
 0x403   : > { %s596_s11 = scalar_lea.sflag [#allocation7], %s595_s9 }
 0x404   : > { %p758_p1 = pnand %p761_p0, %p988_p8 }
 0x406   : > { %p759_p2 = pneg %p758_p1 }
 0x408   : > { %880 = dma.done.wait (%p759_p2), %s596_s11, 128  }
 0x409   : > { %882 = vsyncadd (%p759_p2), %s596_s11, 4294967168  ;;  %s18_s23 = sadd.s32 1, %s905_s23   ;;  %s1092_s18 = smov %s889_s19 }
 0x40a   : > { %p15_p3 = scmp.ge.s32.totalorder %s18_s23, 4   ;;  %s1093_s19 = smov %s893_s20 }
 0x40b   : > { %s1094_s20 = smov %s994_s6  ;;  %s1095_s21 = smov %s901_s22 }
 0x40c   : > { %s1096_s22 = smov %s1098_s26  ;;  %17 = sbr.rel (!%p15_p3) target bundleno = 4 (0x4), region = 89 }
 0x411   :  { %601 = vsyncpa [#allocation7], 1 }
 0x412   :  { %603 = vsyncpa [#allocation7 + $0x1], 1 }

</bundles_post_ra>
